<compile_context>
chip_gen: v7x
topology: tpu7x:2x2x1
jax: 0.10.0
libtpu: 0.0.40
codegen_flags: <defaults>
</compile_context>

<pallas_src>
import jax
import jax.numpy as jnp
from jax.experimental import pallas as pl
from jax.experimental.pallas import tpu as pltpu


_LANE = 128


def _pad_to(n, m=_LANE):
    return max(m, ((n + m - 1) // m) * m)


def _round_up(n, m):
    return ((n + m - 1) // m) * m


# ----------------------------- fused Pallas kernel --------------------------

def _make_fused_kernel(n_hidden, has_pre_affine):
    """Kernel arg order:
       x, [pre_s, pre_t]?, (W_i^T, shift_i) x n_hidden, fgn_wc, fgn_bias, fgn_csq, fgn_inv, out
    """

    def kernel(*refs):
        x_ref = refs[0]
        idx = 1

        h = x_ref[...]                                                   # (TB, K0) f32

        if has_pre_affine:                                               # n_hidden == 0 only
            ps_ref, pt_ref = refs[idx], refs[idx + 1]
            idx += 2
            h = h * ps_ref[...] + pt_ref[...]

        # hidden Linear+BN layers, folded to  h @ W_eff^T + shift
        for _ in range(n_hidden):
            w_ref, s_ref = refs[idx], refs[idx + 1]
            idx += 2
            h = jnp.dot(h, w_ref[...], preferred_element_type=jnp.float32) + s_ref[...]

        wc_ref, fb_ref, fcsq_ref, finv_ref, o_ref = refs[idx:idx + 5]
        out_pad = o_ref.shape[-1]

        # FGN stage: single merged MXU dot  h @ [W^T | (2*C/sig^2)^T]
        lg = jnp.dot(h, wc_ref[...], preferred_element_type=jnp.float32)  # (TB, 2*out_pad)
        l = lg[:, :out_pad] - fb_ref[...]                                 # linear part
        xc2 = lg[:, out_pad:]                                             # 2 * x.c / sig^2

        x_sq = jnp.sum(h * h, axis=1, keepdims=True)                      # (TB, 1)
        # d2/sig^2, clamped at 0 to guard cancellation (inv_sig2 > 0 so clamp commutes)
        d2s = jnp.maximum(x_sq * finv_ref[...] - xc2 + fcsq_ref[...], 0.0)
        o_ref[...] = l * jnp.exp(-d2s)

    return kernel


# ----------------------------- parameter prep -------------------------------

def init_params(key, in_feats, hidden_l_nums, out_feats):
    """Raw PyTorch-style parameters (eval-mode BN expressed as per-feature scale/shift)."""
    eps = 1e-5

    def bn_params(k, n):
        k1, k2, k3, k4 = jax.random.split(k, 4)
        gamma = 1.0 + 0.1 * jax.random.normal(k1, (n,), jnp.float32)
        beta = 0.1 * jax.random.normal(k2, (n,), jnp.float32)
        mean = 0.1 * jax.random.normal(k3, (n,), jnp.float32)
        var = jax.random.uniform(k4, (n,), jnp.float32, 0.5, 1.5)
        scale = gamma / jnp.sqrt(var + eps)
        shift = beta - mean * scale
        return scale, shift

    keys = jax.random.split(key, 3 + 3 * max(1, len(hidden_l_nums)))
    ki = iter(keys)

    params = {}
    params["ib"] = bn_params(next(ki), in_feats)

    hidden = []
    prev = in_feats
    for h in hidden_l_nums:
        kw, kb, kbn = next(ki), next(ki), next(ki)
        bound = 1.0 / jnp.sqrt(prev)
        w = jax.random.uniform(kw, (h, prev), jnp.float32, -bound, bound)
        b = jax.random.uniform(kb, (h,), jnp.float32, -bound, bound)
        s, t = bn_params(kbn, h)
        hidden.append((w, b, s, t))
        prev = h
    params["hidden"] = hidden

    kw, kc, ks = jax.random.split(next(ki), 3)
    bound = 1.0 / jnp.sqrt(prev)
    params["fgn_w"] = jax.random.uniform(kw, (out_feats, prev), jnp.float32, -bound, bound)
    params["fgn_c"] = 0.5 * jax.random.normal(kc, (out_feats, prev), jnp.float32)
    params["fgn_sig"] = jax.random.uniform(ks, (out_feats,), jnp.float32, 1.0, 3.0)
    return params


def fold_params(params, in_feats, hidden_l_nums, out_feats):
    """One-time algebraic folding + transpose + 128-lane zero-padding of all weights."""
    s_in, t_in = params["ib"]
    n_hidden = len(params["hidden"])
    has_pre_affine = (n_hidden == 0)

    flat = []

    # affine applied before the first matmul (the input BatchNorm)
    a = s_in
    c = t_in
    if has_pre_affine:
        # No Linear to fold the input BN into: apply it inside the kernel (not in the wrapper).
        flat += [s_in.reshape(1, -1), t_in.reshape(1, -1)]
        a = jnp.ones((in_feats,), jnp.float32)
        c = jnp.zeros((in_feats,), jnp.float32)

    prev = in_feats
    prev_pad = in_feats                       # x itself is not feature-padded (full-array block)
    for (w, b, bn_s, bn_t) in params["hidden"]:
        h = w.shape[0]
        h_pad = _pad_to(h)
        # y = ((x*a + c) @ W.T + b) * bn_s + bn_t  ==  x @ W_eff^T + shift
        w_eff_t = (w * a[None, :]).T * bn_s[None, :]                 # (prev, h)
        shift = (w @ c + b) * bn_s + bn_t                            # (h,)
        wp = jnp.zeros((prev_pad, h_pad), jnp.float32).at[:prev, :h].set(w_eff_t)
        sp = jnp.zeros((1, h_pad), jnp.float32).at[0, :h].set(shift)
        flat += [wp, sp]
        a = jnp.ones((h,), jnp.float32)
        c = jnp.zeros((h,), jnp.float32)
        prev, prev_pad = h, h_pad

    # FGN layer constants (weight-only, precomputed; sigma scalings folded in)
    W, C, sig = params["fgn_w"], params["fgn_c"], params["fgn_sig"]
    out_pad = _pad_to(out_feats)
    inv_sig2 = 1.0 / (sig * sig)                                     # (out_feats,)

    # merged [ W^T | (2*C/sig^2)^T ]  ->  one MXU dot in-kernel
    wc = jnp.zeros((prev_pad, 2 * out_pad), jnp.float32)
    wc = wc.at[:prev, :out_feats].set(W.T)
    wc = wc.at[:prev, out_pad:out_pad + out_feats].set((C * (2.0 * inv_sig2)[:, None]).T)

    wc_bias = jnp.zeros((1, out_pad), jnp.float32).at[0, :out_feats].set(jnp.sum(W * C, axis=1))
    c_sq_s = jnp.zeros((1, out_pad), jnp.float32).at[0, :out_feats].set(
        jnp.sum(C * C, axis=1) * inv_sig2)
    # padded columns get inv=1, csq=0, cT=0 -> exp(-x_sq) (finite), and l=0 there -> output 0
    inv_p = jnp.ones((1, out_pad), jnp.float32).at[0, :out_feats].set(inv_sig2)
    flat += [wc, wc_bias, c_sq_s, inv_p]

    return {
        "flat": flat,
        "has_pre_affine": has_pre_affine,
        "n_hidden": n_hidden,
        "in_feats": in_feats,
        "out_feats": out_feats,
        "out_pad": out_pad,
    }


# ----------------------------- forward --------------------------------------

def _pick_batch_tile(B):
    """Tile rows: multiple of 8 sublanes, capped at 512, >=2 grid steps once B > 8 (megacore)."""
    if B <= 8:
        return 8
    return min(512, _round_up(pl.cdiv(B, 2), 8))


def forward_pallas(x, folded):
    in_feats = folded["in_feats"]
    out_feats = folded["out_feats"]
    out_pad = folded["out_pad"]
    n_hidden = folded["n_hidden"]
    has_pre = folded["has_pre_affine"]
    weights = folded["flat"]

    x2 = x.reshape(-1, in_feats).astype(jnp.float32)          # x.view(-1, in_feats)
    B = x2.shape[0]

    tb = _pick_batch_tile(B)
    B_pad = _round_up(B, tb)
    if B_pad != B:                                            # wrapper-side ragged-row padding
        x2 = jnp.pad(x2, ((0, B_pad - B), (0, 0)))
    grid = (B_pad // tb,)

    in_specs = [pl.BlockSpec((tb, in_feats), lambda i: (i, 0))]
    in_specs += [pl.BlockSpec(w.shape, lambda i: (0, 0)) for w in weights]
    out_specs = pl.BlockSpec((tb, out_pad), lambda i: (i, 0))

    # advisory cost estimate (matmul flops + exp count + bytes moved)
    flops = 0
    for w in weights:
        if w.ndim == 2 and w.shape[0] > 1:
            flops += 2 * B_pad * w.shape[0] * w.shape[1]
    flops += 10 * B_pad * out_pad
    bytes_accessed = x2.size * 4 + sum(int(w.size) * 4 for w in weights) + B_pad * out_pad * 4
    ce = pl.CostEstimate(flops=int(flops), transcendentals=int(B_pad * out_pad),
                         bytes_accessed=int(bytes_accessed))

    out = pl.pallas_call(
        _make_fused_kernel(n_hidden, has_pre),
        out_shape=jax.ShapeDtypeStruct((B_pad, out_pad), jnp.float32),
        grid=grid,
        in_specs=in_specs,
        out_specs=out_specs,
        compiler_params=pltpu.CompilerParams(dimension_semantics=("parallel",)),
        cost_estimate=ce,
    )(x2, *weights)

    return out[:B, :out_feats]


def forward_reference(x, params, in_feats):
    x = x.reshape(-1, in_feats).astype(jnp.float32)
    s, t = params["ib"]
    x = x * s + t
    for (w, b, bs, bt) in params["hidden"]:
        x = x @ w.T + b
        x = x * bs + bt
    W, C, sig = params["fgn_w"], params["fgn_c"], params["fgn_sig"]
    l = x @ W.T - jnp.sum(W * C, axis=1)
    d2 = jnp.sum((x[:, None, :] - C[None, :, :]) ** 2, axis=-1)
    g = jnp.exp(-d2 / (sig * sig))
    return l * g


# ----------------------------- main -----------------------------------------

if __name__ == "__main__":
    in_feats = 256
    hidden_l_nums = [64, 32]
    out_feats = 16

    key = jax.random.PRNGKey(0)
    kx, kp = jax.random.split(key)

    # NCHW-style input, flattened by view(-1, in_feats): 2*4*16*16 / 256 = 8 rows.
    x = jax.random.normal(kx, (2, 4, 16, 16), jnp.float32)
    params = init_params(kp, in_feats, hidden_l_nums, out_feats)
    folded = fold_params(params, in_feats, hidden_l_nums, out_feats)

    out = forward_pallas(x, folded)
    out = jax.block_until_ready(out)

    ref = forward_reference(x, params, in_feats)
    assert out.shape == (8, out_feats), out.shape
    max_err = float(jnp.max(jnp.abs(out - ref)))
    assert jnp.allclose(out, ref, rtol=1e-3, atol=1e-3), max_err

    print("KERNEL_OK")
</pallas_src>

<mosaic_0001>
module attributes {stable_mosaic.version = 11 : i64} {
  func.func @kernel(%arg0: i32, %arg1: memref<8x256xf32, #tpu.memory_space<vmem>>, %arg2: memref<256x128xf32, #tpu.memory_space<vmem>>, %arg3: memref<1x128xf32, #tpu.memory_space<vmem>>, %arg4: memref<128x128xf32, #tpu.memory_space<vmem>>, %arg5: memref<1x128xf32, #tpu.memory_space<vmem>>, %arg6: memref<128x256xf32, #tpu.memory_space<vmem>>, %arg7: memref<1x128xf32, #tpu.memory_space<vmem>>, %arg8: memref<1x128xf32, #tpu.memory_space<vmem>>, %arg9: memref<1x128xf32, #tpu.memory_space<vmem>>, %arg10: memref<8x128xf32, #tpu.memory_space<vmem>>) attributes {dimension_semantics = [#tpu.dimension_semantics<parallel>], iteration_bounds = array<i64: 1>, scalar_prefetch = 0 : i64, scratch_operands = 0 : i64, tpu.core_type = #tpu.core_type<tc>, window_params = [{transform_indices = @transform_0, window_bounds = array<i64: 8, 256>}, {pipeline_mode = #tpu.pipeline_mode<synchronous>, transform_indices = @transform_1, window_bounds = array<i64: 256, 128>}, {pipeline_mode = #tpu.pipeline_mode<synchronous>, transform_indices = @transform_2, window_bounds = array<i64: 1, 128>}, {pipeline_mode = #tpu.pipeline_mode<synchronous>, transform_indices = @transform_3, window_bounds = array<i64: 128, 128>}, {pipeline_mode = #tpu.pipeline_mode<synchronous>, transform_indices = @transform_4, window_bounds = array<i64: 1, 128>}, {pipeline_mode = #tpu.pipeline_mode<synchronous>, transform_indices = @transform_5, window_bounds = array<i64: 128, 256>}, {pipeline_mode = #tpu.pipeline_mode<synchronous>, transform_indices = @transform_6, window_bounds = array<i64: 1, 128>}, {pipeline_mode = #tpu.pipeline_mode<synchronous>, transform_indices = @transform_7, window_bounds = array<i64: 1, 128>}, {pipeline_mode = #tpu.pipeline_mode<synchronous>, transform_indices = @transform_8, window_bounds = array<i64: 1, 128>}, {transform_indices = @transform_9, window_bounds = array<i64: 8, 128>}]} {
    %c0 = arith.constant 0 : index
    %c0_0 = arith.constant 0 : index
    %0 = vector.load %arg1[%c0, %c0_0] : memref<8x256xf32, #tpu.memory_space<vmem>>, vector<8x256xf32>
    %c0_1 = arith.constant 0 : index
    %c0_2 = arith.constant 0 : index
    %1 = vector.load %arg2[%c0_1, %c0_2] : memref<256x128xf32, #tpu.memory_space<vmem>>, vector<256x128xf32>
    %cst = arith.constant dense<0.000000e+00> : vector<8x128xf32>
    %2 = tpu.matmul %0, %1, %cst {dimension_numbers = #tpu.dot_dimension_numbers<[1], [0], [0], [1], [0, 0, 1, 1], [], []>} : vector<8x256xf32>, vector<256x128xf32>, vector<8x128xf32> -> vector<8x128xf32>
    %c0_3 = arith.constant 0 : index
    %c0_4 = arith.constant 0 : index
    %3 = vector.load %arg3[%c0_3, %c0_4] : memref<1x128xf32, #tpu.memory_space<vmem>>, vector<1x128xf32>
    %4 = vector.broadcast %3 : vector<1x128xf32> to vector<8x128xf32>
    %5 = arith.addf %2, %4 : vector<8x128xf32>
    %c0_5 = arith.constant 0 : index
    %c0_6 = arith.constant 0 : index
    %6 = vector.load %arg4[%c0_5, %c0_6] : memref<128x128xf32, #tpu.memory_space<vmem>>, vector<128x128xf32>
    %cst_7 = arith.constant dense<0.000000e+00> : vector<8x128xf32>
    %7 = tpu.matmul %5, %6, %cst_7 {dimension_numbers = #tpu.dot_dimension_numbers<[1], [0], [0], [1], [0, 0, 1, 1], [], []>} : vector<8x128xf32>, vector<128x128xf32>, vector<8x128xf32> -> vector<8x128xf32>
    %c0_8 = arith.constant 0 : index
    %c0_9 = arith.constant 0 : index
    %8 = vector.load %arg5[%c0_8, %c0_9] : memref<1x128xf32, #tpu.memory_space<vmem>>, vector<1x128xf32>
    %9 = vector.broadcast %8 : vector<1x128xf32> to vector<8x128xf32>
    %10 = arith.addf %7, %9 : vector<8x128xf32>
    %c0_10 = arith.constant 0 : index
    %c0_11 = arith.constant 0 : index
    %11 = vector.load %arg6[%c0_10, %c0_11] : memref<128x256xf32, #tpu.memory_space<vmem>>, vector<128x256xf32>
    %cst_12 = arith.constant dense<0.000000e+00> : vector<8x256xf32>
    %12 = tpu.matmul %10, %11, %cst_12 {dimension_numbers = #tpu.dot_dimension_numbers<[1], [0], [0], [1], [0, 0, 1, 1], [], []>} : vector<8x128xf32>, vector<128x256xf32>, vector<8x256xf32> -> vector<8x256xf32>
    %13 = vector.extract_strided_slice %12 {offsets = [0, 0], sizes = [8, 128], strides = [1, 1]} : vector<8x256xf32> to vector<8x128xf32>
    %c0_13 = arith.constant 0 : index
    %c0_14 = arith.constant 0 : index
    %14 = vector.load %arg7[%c0_13, %c0_14] : memref<1x128xf32, #tpu.memory_space<vmem>>, vector<1x128xf32>
    %15 = vector.broadcast %14 : vector<1x128xf32> to vector<8x128xf32>
    %16 = arith.subf %13, %15 : vector<8x128xf32>
    %17 = vector.extract_strided_slice %12 {offsets = [0, 128], sizes = [8, 128], strides = [1, 1]} : vector<8x256xf32> to vector<8x128xf32>
    %18 = arith.mulf %10, %10 : vector<8x128xf32>
    %cst_15 = arith.constant dense<0.000000e+00> : vector<8xf32>
    %19 = vector.multi_reduction <add>, %18, %cst_15 [1] : vector<8x128xf32> to vector<8xf32>
    %20 = vector.shape_cast %19 : vector<8xf32> to vector<8x1xf32>
    %c0_16 = arith.constant 0 : index
    %c0_17 = arith.constant 0 : index
    %21 = vector.load %arg9[%c0_16, %c0_17] : memref<1x128xf32, #tpu.memory_space<vmem>>, vector<1x128xf32>
    %22 = vector.broadcast %20 : vector<8x1xf32> to vector<8x128xf32>
    %23 = vector.broadcast %21 : vector<1x128xf32> to vector<8x128xf32>
    %24 = arith.mulf %22, %23 : vector<8x128xf32>
    %25 = arith.subf %24, %17 : vector<8x128xf32>
    %c0_18 = arith.constant 0 : index
    %c0_19 = arith.constant 0 : index
    %26 = vector.load %arg8[%c0_18, %c0_19] : memref<1x128xf32, #tpu.memory_space<vmem>>, vector<1x128xf32>
    %27 = vector.broadcast %26 : vector<1x128xf32> to vector<8x128xf32>
    %28 = arith.addf %25, %27 : vector<8x128xf32>
    %cst_20 = arith.constant 0.000000e+00 : f32
    %29 = vector.broadcast %cst_20 : f32 to vector<8x128xf32>
    %30 = arith.maximumf %28, %29 : vector<8x128xf32>
    %cst_21 = arith.constant 0.000000e+00 : f32
    %31 = vector.broadcast %cst_21 : f32 to vector<8x128xf32>
    %32 = arith.subf %31, %30 : vector<8x128xf32>
    %33 = math.exp %32 : vector<8x128xf32>
    %34 = arith.mulf %16, %33 : vector<8x128xf32>
    %c0_22 = arith.constant 0 : index
    %c0_23 = arith.constant 0 : index
    %35 = vector.load %arg10[%c0_22, %c0_23] : memref<8x128xf32, #tpu.memory_space<vmem>>, vector<8x128xf32>
    tpu.vector_store %arg10[%c0_22, %c0_23], %34 {strides = array<i32>} : memref<8x128xf32, #tpu.memory_space<vmem>>, vector<8x128xf32>,
    return
  }
  func.func @transform_0(%arg0: i32) -> (i32, i32) {
    %c0_i32 = arith.constant 0 : i32
    %c0_i32_0 = arith.constant 0 : i32
    return %arg0, %c0_i32 : i32, i32
  }
  func.func @transform_1(%arg0: i32) -> (i32, i32) {
    %c0_i32 = arith.constant 0 : i32
    %c0_i32_0 = arith.constant 0 : i32
    %c0_i32_1 = arith.constant 0 : i32
    return %c0_i32, %c0_i32_0 : i32, i32
  }
  func.func @transform_2(%arg0: i32) -> (i32, i32) {
    %c0_i32 = arith.constant 0 : i32
    %c0_i32_0 = arith.constant 0 : i32
    %c0_i32_1 = arith.constant 0 : i32
    return %c0_i32, %c0_i32_0 : i32, i32
  }
  func.func @transform_3(%arg0: i32) -> (i32, i32) {
    %c0_i32 = arith.constant 0 : i32
    %c0_i32_0 = arith.constant 0 : i32
    %c0_i32_1 = arith.constant 0 : i32
    return %c0_i32, %c0_i32_0 : i32, i32
  }
  func.func @transform_4(%arg0: i32) -> (i32, i32) {
    %c0_i32 = arith.constant 0 : i32
    %c0_i32_0 = arith.constant 0 : i32
    %c0_i32_1 = arith.constant 0 : i32
    return %c0_i32, %c0_i32_0 : i32, i32
  }
  func.func @transform_5(%arg0: i32) -> (i32, i32) {
    %c0_i32 = arith.constant 0 : i32
    %c0_i32_0 = arith.constant 0 : i32
    %c0_i32_1 = arith.constant 0 : i32
    return %c0_i32, %c0_i32_0 : i32, i32
  }
  func.func @transform_6(%arg0: i32) -> (i32, i32) {
    %c0_i32 = arith.constant 0 : i32
    %c0_i32_0 = arith.constant 0 : i32
    %c0_i32_1 = arith.constant 0 : i32
    return %c0_i32, %c0_i32_0 : i32, i32
  }
  func.func @transform_7(%arg0: i32) -> (i32, i32) {
    %c0_i32 = arith.constant 0 : i32
    %c0_i32_0 = arith.constant 0 : i32
    %c0_i32_1 = arith.constant 0 : i32
    return %c0_i32, %c0_i32_0 : i32, i32
  }
  func.func @transform_8(%arg0: i32) -> (i32, i32) {
    %c0_i32 = arith.constant 0 : i32
    %c0_i32_0 = arith.constant 0 : i32
    %c0_i32_1 = arith.constant 0 : i32
    return %c0_i32, %c0_i32_0 : i32, i32
  }
  func.func @transform_9(%arg0: i32) -> (i32, i32) {
    %c0_i32 = arith.constant 0 : i32
    %c0_i32_0 = arith.constant 0 : i32
    return %arg0, %c0_i32 : i32, i32
  }
}

</mosaic_0001>

<bundles_post_ra>
// kernel: tpu_custom_call.1
= control target key start
LH: loop header
LB: loop body
LE: loop exit
PB: predicated region body
PF: predicated region fallthrough
CT: control target
= control target key end

     0   :  { %14 = vsyncpa [#allocation3], 0  ;;  %s907_s0 = inlined_call_operand.hbm [shape: f32[8,256], index: 0, kind: input, shape index: {}]   ;;  %s908_s1 = inlined_call_operand.hbm [shape: f32[256,128], index: 1, kind: input, shape index: {}]   ;;  %s909_s2 = inlined_call_operand.vmem [shape: f32[1,128], index: 2, kind: input, shape index: {}]   ;;  %s910_s3 = inlined_call_operand.hbm [shape: f32[128,128], index: 3, kind: input, shape index: {}]   ;;  %s911_s4 = inlined_call_operand.vmem [shape: f32[1,128], index: 4, kind: input, shape index: {}]   ;;  %s912_s5 = inlined_call_operand.hbm [shape: f32[128,256], index: 5, kind: input, shape index: {}]   ;;  %s913_s6 = inlined_call_operand.vmem [shape: f32[1,128], index: 6, kind: input, shape index: {}]   ;;  %s914_s7 = inlined_call_operand.vmem [shape: f32[1,128], index: 7, kind: input, shape index: {}]   ;;  %s915_s8 = inlined_call_operand.vmem [shape: f32[1,128], index: 8, kind: input, shape index: {}]   ;;  %s916_s9 = inlined_call_operand.hbm [shape: f32[8,128], index: 9, kind: output, shape index: {}]  }
   0x1   :  { %15 = vsyncpa [#allocation6], 0 }
   0x2   :  { %16 = vsyncpa [#allocation9], 0 }
   0x3   :  { %17 = vsyncpa [#allocation4], 0  ;;  %s756_s30 = smov [#allocation5]   ;;  %s638_s13 = scalar_lea.hbm %s908_s1, 4096 }
   0x4   :  { %s33_s10 = sshll.u32 %s756_s30, 4  ;;  %p639_p0 = scmp.ne.s32.totalorder %s908_s1, %s638_s13  ;;  %s34_s10 = int_to_ptr.vmem [resolvable:$true] %s33_s10 }
   0x5   :  { %p642_p1 = scmp.lt.u32.totalorder %s638_s13, %s908_s1 }
   0x7   :  { %p644_p2 = pnand %p642_p1, %p639_p0 }
   0x9   :  { %647 = shalt.err (!%p644_p2)
}
   0xa   :  { %s648_s18 = scalar_lea.vmem %s34_s10, 4096  ;;  %p653_p4 = scmp.lt.s32.totalorder %s34_s10, %s34_s10 }
   0xb   :  { %p649_p3 = scmp.ne.s32.totalorder %s34_s10, %s648_s18  ;;  %p654_p5 = scmp.lt.s32.totalorder %s648_s18, %s648_s18 }
   0xd   :  { %p655_p6 = por %p654_p5, %p653_p4 }
   0xf   :  { %p656_p7 = pnand %p655_p6, %p649_p3 }
  0x11   :  { %659 = shalt.err (!%p656_p7)
}
  0x12   :  { %s757_s19 = smov 128   ;;  %s758_s20 = smov 8  }
  0x13   :  { %39 = dma.hbm_to_vmem [thread:$0]  %s908_s1, 4096, %s34_s10, [#allocation6], %s757_s19, %s757_s19, %s758_s20  }
  0x14   :  { %s759_s23 = smov [#allocation2]   ;;  %s760_s25 = smov [#allocation7]  }
  0x15   :  { %s24_s24 = sshll.u32 %s759_s23, 4  ;;  %s47_s26 = sshll.u32 %s760_s25, 4  ;;  %s25_s24 = int_to_ptr.vmem [resolvable:$true] %s24_s24  ;;  %s48_s26 = int_to_ptr.vmem [resolvable:$true] %s47_s26 }
  0x16   :  { %s660_s29 = scalar_lea.hbm %s907_s0, 256 }
  0x17   :  { %p661_p8 = scmp.ne.s32.totalorder %s907_s0, %s660_s29  ;;  %p664_p9 = scmp.lt.u32.totalorder %s660_s29, %s907_s0 }
  0x19   :  { %p666_p10 = pnand %p664_p9, %p661_p8 }
  0x1b   :  { %669 = shalt.err (!%p666_p10)
}
  0x1c   :  { %s670_s1 = scalar_lea.vmem %s25_s24, 256  ;;  %p675_p12 = scmp.lt.s32.totalorder %s25_s24, %s25_s24 }
  0x1d   :  { %p671_p11 = scmp.ne.s32.totalorder %s25_s24, %s670_s1  ;;  %p676_p13 = scmp.lt.s32.totalorder %s670_s1, %s670_s1 }
  0x1f   :  { %p677_p0 = por %p676_p13, %p675_p12 }
  0x21   :  { %p678_p1 = pnand %p677_p0, %p671_p11 }
  0x23   :  { %681 = shalt.err (!%p678_p1)
}
  0x24   :  { %27 = dma.hbm_to_vmem [thread:$0]  %s907_s0, 256, %s25_s24, [#allocation3]  }
  0x25   :  { %s682_s17 = scalar_lea.hbm %s910_s3, 2048 }
  0x26   :  { %p683_p2 = scmp.ne.s32.totalorder %s910_s3, %s682_s17  ;;  %p686_p3 = scmp.lt.u32.totalorder %s682_s17, %s910_s3 }
  0x28   :  { %p688_p4 = pnand %p686_p3, %p683_p2 }
  0x2a   :  { %691 = shalt.err (!%p688_p4)
}
  0x2b   :  { %s692_s25 = scalar_lea.vmem %s48_s26, 2048  ;;  %p697_p6 = scmp.lt.s32.totalorder %s48_s26, %s48_s26 }
  0x2c   :  { %p693_p5 = scmp.ne.s32.totalorder %s48_s26, %s692_s25  ;;  %p698_p7 = scmp.lt.s32.totalorder %s692_s25, %s692_s25 }
  0x2e   :  { %p699_p8 = por %p698_p7, %p697_p6 }
  0x30   :  { %p700_p9 = pnand %p699_p8, %p693_p5 }
  0x32   :  { %703 = shalt.err (!%p700_p9)
}
  0x33   :  { %53 = dma.hbm_to_vmem [thread:$0]  %s910_s3, 2048, %s48_s26, [#allocation6], %s757_s19, %s757_s19, %s758_s20  }
  0x34   :  { %s761_s27 = smov [#allocation8]   ;;  %s704_s11 = scalar_lea.hbm %s912_s5, 4096 }
  0x35   :  { %s61_s28 = sshll.u32 %s761_s27, 4  ;;  %p705_p10 = scmp.ne.s32.totalorder %s912_s5, %s704_s11  ;;  %s62_s28 = int_to_ptr.vmem [resolvable:$true] %s61_s28 }
  0x36   :  { %p708_p11 = scmp.lt.u32.totalorder %s704_s11, %s912_s5 }
  0x38   :  { %p710_p12 = pnand %p708_p11, %p705_p10 }
  0x3a   :  { %713 = shalt.err (!%p710_p12)
}
  0x3b   :  { %s714_s14 = scalar_lea.vmem %s62_s28, 4096  ;;  %p719_p0 = scmp.lt.s32.totalorder %s62_s28, %s62_s28 }
  0x3c   :  { %p715_p13 = scmp.ne.s32.totalorder %s62_s28, %s714_s14  ;;  %p720_p1 = scmp.lt.s32.totalorder %s714_s14, %s714_s14 }
  0x3e   :  { %p721_p2 = por %p720_p1, %p719_p0 }
  0x40   :  { %p722_p3 = pnand %p721_p2, %p715_p13 }
  0x42   :  { %725 = shalt.err (!%p722_p3)
}
  0x43   :  { %s762_s3 = smov 256   ;;  %s763_s19 = smov 16  }
  0x44   :  { %67 = dma.hbm_to_vmem [thread:$0]  %s912_s5, 4096, %s62_s28, [#allocation9], %s762_s3, %s762_s3, %s763_s19  }
  0x45   :  { %748 = dma.done.wait [#allocation3], 256  }
  0x46   :  { %749 = vsyncadd [#allocation3], 4294967040 }
  0x47   :  { %750 = dma.done.wait [#allocation6], 6144  }
  0x48   :  { %751 = vsyncadd [#allocation6], 4294961152 }
  0x49   :  { %752 = dma.done.wait [#allocation9], 4096  }
  0x4a   :  { %753 = vsyncadd [#allocation9], 4294963200  ;;  %v764_v0 = vmov 0.0|0.0   ;;  %v104_v1 = vld [vmem:[#allocation5 + $0x80] sm:$0xff]  ;;  %v105_v2 = vld [vmem:[#allocation5 + $0x88] sm:$0xff]  ;;  %vm765_vm0 = vmmov 0  }
  0x4b   :  { %568 = vmatprep.subr.bf16.mxu1 %v764_v0  ;;  %v88_v3 = vld [vmem:[#allocation5] sm:$0xff]  ;;  %v536_v4 = vpack.c.bf16 %v105_v2, %v104_v1  ;;  %v89_v5 = vld [vmem:[#allocation5 + $0x8] sm:$0xff]  ;;  %v106_v6 = vld [vmem:[#allocation5 + $0x90] sm:$0xff]  ;;  %s767_s25 = smov [#allocation10]  }
  0x4c   :  { %v107_v7 = vld [vmem:[#allocation5 + $0x98] sm:$0xff]  ;;  %v538_v8 = vpack.c.bf16 %v89_v5, %v88_v3  ;;  %v90_v10 = vld [vmem:[#allocation5 + $0x10] sm:$0xff]  ;;  %v108_v12 = vld [vmem:[#allocation5 + $0xa0] sm:$0xff]  ;;  %s433_s0 = sshll.u32 %s767_s25, 4  ;;  %s434_s0 = int_to_ptr.vmem [resolvable:$true] %s433_s0 }
  0x4d   :  { %v540_v9 = vpack.c.bf16 %v107_v7, %v106_v6  ;;  %v91_v11 = vld [vmem:[#allocation5 + $0x18] sm:$0xff]  ;;  %537 = vmatprep.subr.bf16.mxu0 %v536_v4  ;;  %v109_v13 = vld [vmem:[#allocation5 + $0xa8] sm:$0xff]  ;;  %v92_v16 = vld [vmem:[#allocation5 + $0x20] sm:$0xff]  ;;  %p731_p5 = scmp.lt.s32.totalorder %s434_s0, %s434_s0 }
  0x4e   :  { %539 = vmatpush3.bf16.msra.mxu0 %v538_v8  ;;  %v542_v14 = vpack.c.bf16 %v91_v11, %v90_v10  ;;  %v544_v15 = vpack.c.bf16 %v109_v13, %v108_v12  ;;  %v93_v17 = vld [vmem:[#allocation5 + $0x28] sm:$0xff]  ;;  %v110_v18 = vld [vmem:[#allocation5 + $0xb0] sm:$0xff]  ;;  %v111_v19 = vld [vmem:[#allocation5 + $0xb8] sm:$0xff]  ;;  %v766_v12 = vmov 0.0  }
  0x4f   :  { %541 = vmatprep.subr.bf16.mxu0 %v540_v9  ;;  %v546_v20 = vpack.c.bf16 %v93_v17, %v92_v16  ;;  %v548_v21 = vpack.c.bf16 %v111_v19, %v110_v18  ;;  %v94_v22 = vld [vmem:[#allocation5 + $0x30] sm:$0xff]  ;;  %v95_v23 = vld [vmem:[#allocation5 + $0x38] sm:$0xff]  ;;  %v112_v24 = vld [vmem:[#allocation5 + $0xc0] sm:$0xff]  ;;  %533 = vmatprep.mubr.msk.f32.mxu1 %vm765_vm0, %v766_v12 }
  0x50   :  { %v113_v25 = vld [vmem:[#allocation5 + $0xc8] sm:$0xff]  ;;  %v87_v26 = vld [vmem:[#allocation2 + $0x8] sm:$0xff]  ;;  %v197_v27 = vld [vmem:[#allocation7] sm:$0xff]  ;;  %v550_v29 = vpack.c.bf16 %v95_v23, %v94_v22 }
  0x51   :  { %191 = vmatprep.mubr.f32.mxu0 %v87_v26  ;;  %v198_v28 = vld [vmem:[#allocation7 + $0x8] sm:$0xff]  ;;  %v199_v31 = vld [vmem:[#allocation7 + $0x10] sm:$0xff]  ;;  %v200_v32 = vld [vmem:[#allocation7 + $0x18] sm:$0xff]  ;;  %v552_v33 = vpack.c.bf16 %v113_v25, %v112_v24 }
  0x52   :  { %543 = vmatpush3.bf16.msra.mxu0 %v542_v14  ;;  %v569_v30 = vpack.c.bf16 %v198_v28, %v197_v27  ;;  %v96_v34 = vld [vmem:[#allocation5 + $0x40] sm:$0xff]  ;;  %v97_v35 = vld [vmem:[#allocation5 + $0x48] sm:$0xff]  ;;  %v114_v36 = vld [vmem:[#allocation5 + $0xd0] sm:$0xff]  ;;  %v572_v38 = vpack.c.bf16 %v200_v32, %v199_v31 }
  0x53   :  { %545 = vmatprep.subr.bf16.mxu0 %v544_v15  ;;  %v115_v37 = vld [vmem:[#allocation5 + $0xd8] sm:$0xff]  ;;  %v201_v39 = vld [vmem:[#allocation7 + $0x20] sm:$0xff]  ;;  %v202_v40 = vld [vmem:[#allocation7 + $0x28] sm:$0xff]  ;;  %v554_v41 = vpack.c.bf16 %v97_v35, %v96_v34 }
  0x54   :  { %570 = vmatpush3.bf16.msra.mxu1 %v569_v30  ;;  %v556_v42 = vpack.c.bf16 %v115_v37, %v114_v36  ;;  %v98_v43 = vld [vmem:[#allocation5 + $0x50] sm:$0xff]  ;;  %v99_v44 = vld [vmem:[#allocation5 + $0x58] sm:$0xff]  ;;  %v116_v45 = vld [vmem:[#allocation5 + $0xe0] sm:$0xff]  ;;  %v575_v47 = vpack.c.bf16 %v202_v40, %v201_v39 }
  0x55   :  { %571 = vmatprep.subr.bf16.mxu1 %v764_v0  ;;  %v117_v46 = vld [vmem:[#allocation5 + $0xe8] sm:$0xff]  ;;  %v203_v48 = vld [vmem:[#allocation7 + $0x30] sm:$0xff]  ;;  %v204_v49 = vld [vmem:[#allocation7 + $0x38] sm:$0xff]  ;;  %v558_v50 = vpack.c.bf16 %v99_v44, %v98_v43 }
  0x56   :  { %547 = vmatpush3.bf16.msra.mxu0 %v546_v20  ;;  %v560_v51 = vpack.c.bf16 %v117_v46, %v116_v45  ;;  %v100_v52 = vld [vmem:[#allocation5 + $0x60] sm:$0xff]  ;;  %v101_v53 = vld [vmem:[#allocation5 + $0x68] sm:$0xff]  ;;  %v118_v54 = vld [vmem:[#allocation5 + $0xf0] sm:$0xff]  ;;  %v578_v56 = vpack.c.bf16 %v204_v49, %v203_v48 }
  0x57   :  { %549 = vmatprep.subr.bf16.mxu0 %v548_v21  ;;  %v119_v55 = vld [vmem:[#allocation5 + $0xf8] sm:$0xff]  ;;  %v205_v57 = vld [vmem:[#allocation7 + $0x40] sm:$0xff]  ;;  %v206_v58 = vld [vmem:[#allocation7 + $0x48] sm:$0xff]  ;;  %v562_v59 = vpack.c.bf16 %v101_v53, %v100_v52 }
  0x58   :  { %573 = vmatpush3.bf16.msra.mxu1 %v572_v38  ;;  %v564_v60 = vpack.c.bf16 %v119_v55, %v118_v54  ;;  %v102_v61 = vld [vmem:[#allocation5 + $0x70] sm:$0xff]  ;;  %v103_v62 = vld [vmem:[#allocation5 + $0x78] sm:$0xff]  ;;  %v581_v63 = vpack.c.bf16 %v206_v58, %v205_v57  ;;  %v209_v5 = vld [vmem:[#allocation7 + $0x60] sm:$0xff] }
  0x59   :  { %574 = vmatprep.subr.bf16.mxu1 %v764_v0  ;;  %v207_v1 = vld [vmem:[#allocation7 + $0x50] sm:$0xff]  ;;  %v208_v2 = vld [vmem:[#allocation7 + $0x58] sm:$0xff]  ;;  %v566_v3 = vpack.c.bf16 %v103_v62, %v102_v61  ;;  %v210_v6 = vld [vmem:[#allocation7 + $0x68] sm:$0xff] }
  0x5a   :  { %551 = vmatpush3.bf16.msra.mxu0 %v550_v29  ;;  %v584_v4 = vpack.c.bf16 %v208_v2, %v207_v1  ;;  %v86_v7 = vld [vmem:[#allocation2] sm:$0xff]  ;;  %v587_v8 = vpack.c.bf16 %v210_v6, %v209_v5  ;;  %v212_v10 = vld [vmem:[#allocation7 + $0x78] sm:$0xff]  ;;  %v291_v13 = vld [vmem:[#allocation8 + $0x8] sm:$0xff] }
  0x5b   :  { %553 = vmatprep.subr.bf16.mxu0 %v552_v33  ;;  %v211_v9 = vld [vmem:[#allocation7 + $0x70] sm:$0xff]  ;;  %v293_v14 = vld [vmem:[#allocation8 + $0x18] sm:$0xff]  ;;  %v290_v15 = vld [vmem:[#allocation8] sm:$0xff] }
  0x5c   :  { %576 = vmatpush3.bf16.msra.mxu1 %v575_v47  ;;  %v590_v11 = vpack.c.bf16 %v212_v10, %v211_v9  ;;  %v592_v16 = vpack.c.bf16 %v293_v14, %v291_v13  ;;  %v292_v17 = vld [vmem:[#allocation8 + $0x10] sm:$0xff]  ;;  %v295_v18 = vld [vmem:[#allocation8 + $0x28] sm:$0xff]  ;;  %v297_v19 = vld [vmem:[#allocation8 + $0x38] sm:$0xff] }
  0x5d   :  { %577 = vmatprep.subr.bf16.mxu1 %v764_v0  ;;  %v594_v20 = vpack.c.bf16 %v292_v17, %v290_v15  ;;  %v596_v21 = vpack.c.bf16 %v297_v19, %v295_v18  ;;  %v294_v22 = vld [vmem:[#allocation8 + $0x20] sm:$0xff]  ;;  %v296_v23 = vld [vmem:[#allocation8 + $0x30] sm:$0xff]  ;;  %v301_v24 = vld [vmem:[#allocation8 + $0x58] sm:$0xff] }
  0x5e   :  { %555 = vmatpush3.bf16.msra.mxu0 %v554_v41  ;;  %v598_v25 = vpack.c.bf16 %v296_v23, %v294_v22  ;;  %v298_v27 = vld [vmem:[#allocation8 + $0x40] sm:$0xff]  ;;  %v300_v28 = vld [vmem:[#allocation8 + $0x50] sm:$0xff]  ;;  %v303_v29 = vld [vmem:[#allocation8 + $0x68] sm:$0xff] }
  0x5f   :  { %557 = vmatprep.subr.bf16.mxu0 %v556_v42  ;;  %v305_v30 = vld [vmem:[#allocation8 + $0x78] sm:$0xff]  ;;  %v602_v31 = vpack.c.bf16 %v300_v28, %v298_v27  ;;  %v302_v33 = vld [vmem:[#allocation8 + $0x60] sm:$0xff]  ;;  %v304_v34 = vld [vmem:[#allocation8 + $0x70] sm:$0xff] }
  0x60   :  { %579 = vmatpush3.bf16.msra.mxu1 %v578_v56  ;;  %v604_v32 = vpack.c.bf16 %v305_v30, %v303_v29  ;;  %v307_v35 = vld [vmem:[#allocation8 + $0x88] sm:$0xff]  ;;  %v309_v36 = vld [vmem:[#allocation8 + $0x98] sm:$0xff]  ;;  %v606_v37 = vpack.c.bf16 %v304_v34, %v302_v33  ;;  %v306_v39 = vld [vmem:[#allocation8 + $0x80] sm:$0xff] }
  0x61   :  { %580 = vmatprep.subr.bf16.mxu1 %v764_v0  ;;  %v608_v38 = vpack.c.bf16 %v309_v36, %v307_v35  ;;  %v308_v40 = vld [vmem:[#allocation8 + $0x90] sm:$0xff]  ;;  %v311_v41 = vld [vmem:[#allocation8 + $0xa8] sm:$0xff]  ;;  %v313_v42 = vld [vmem:[#allocation8 + $0xb8] sm:$0xff] }
  0x62   :  { %559 = vmatpush3.bf16.msra.mxu0 %v558_v50  ;;  %v610_v43 = vpack.c.bf16 %v308_v40, %v306_v39  ;;  %v612_v44 = vpack.c.bf16 %v313_v42, %v311_v41  ;;  %v310_v45 = vld [vmem:[#allocation8 + $0xa0] sm:$0xff]  ;;  %v312_v46 = vld [vmem:[#allocation8 + $0xb0] sm:$0xff]  ;;  %v315_v47 = vld [vmem:[#allocation8 + $0xc8] sm:$0xff] }
  0x63   :  { %561 = vmatprep.subr.bf16.mxu0 %v560_v51  ;;  %v317_v48 = vld [vmem:[#allocation8 + $0xd8] sm:$0xff]  ;;  %v614_v49 = vpack.c.bf16 %v312_v46, %v310_v45  ;;  %v314_v51 = vld [vmem:[#allocation8 + $0xc0] sm:$0xff]  ;;  %v316_v52 = vld [vmem:[#allocation8 + $0xd0] sm:$0xff] }
  0x64   :  { %582 = vmatpush3.bf16.msra.mxu1 %v581_v63  ;;  %v616_v50 = vpack.c.bf16 %v317_v48, %v315_v47  ;;  %v319_v53 = vld [vmem:[#allocation8 + $0xe8] sm:$0xff]  ;;  %v321_v54 = vld [vmem:[#allocation8 + $0xf8] sm:$0xff]  ;;  %v618_v55 = vpack.c.bf16 %v316_v52, %v314_v51  ;;  %v444_v58 = vld [vmem:[%s909_s2] ss:$0 sm:$0xff] }
  0x65   :  { %583 = vmatprep.subr.bf16.mxu1 %v764_v0  ;;  %v620_v56 = vpack.c.bf16 %v321_v54, %v319_v53  ;;  %v318_v62 = vld [vmem:[#allocation8 + $0xe0] sm:$0xff]  ;;  %v320_v63 = vld [vmem:[#allocation8 + $0xf0] sm:$0xff] }
  0x66   :  { %563 = vmatpush3.bf16.msra.mxu0 %v562_v59  ;;  %v622_v1 = vpack.c.bf16 %v320_v63, %v318_v62  ;;  %v445_v2 = vld [vmem:[%s911_s4] ss:$0 sm:$0xff] }
  0x67   :  { %565 = vmatprep.subr.bf16.mxu0 %v564_v60  ;;  %v446_v18 = vld [vmem:[%s913_s6] ss:$0 sm:$0xff] }
  0x68   :  { %585 = vmatpush3.bf16.msra.mxu1 %v584_v4 }
  0x69   :  { %586 = vmatprep.subr.bf16.mxu1 %v764_v0 }
  0x6a   :  { %567 = vmatpush3.bf16.msra.mxu0 %v566_v3 }
  0x6b   :  { %593 = vmatprep.subr.bf16.mxu0 %v592_v16 }
  0x6c   :  { %588 = vmatpush3.bf16.msra.mxu1 %v587_v8  ;;  %v447_v8 = vld [vmem:[%s915_s8] ss:$0 sm:$0xff]  ;;  %s726_s8 = scalar_lea.vmem %s434_s0, 128 }
  0x6d   :  { %192 = vmatmul.mubr.f32.vlgmr.msra.gmra.mrb[0].mxu0 %v86_v7  ;;  %589 = vmatprep.subr.bf16.mxu1 %v764_v0  ;;  %v299_v0 = vld [vmem:[#allocation8 + $0x48] sm:$0xff]  ;;  %p727_p4 = scmp.ne.s32.totalorder %s434_s0, %s726_s8  ;;  %p732_p6 = scmp.lt.s32.totalorder %s726_s8, %s726_s8 }
  0x6e   :  { %386 = vmatprep.mubr.f32.mxu0 %v766_v12  ;;  %595 = vmatpush1.bf16.msra.mxu0 %v594_v20  ;;  %v600_v26 = vpack.c.bf16 %v301_v24, %v299_v0  ;;  %v448_v12 = vld [vmem:[%s914_s7] ss:$0 sm:$0xff] }
  0x6f   :  { %597 = vmatprep.subr.bf16.mxu0 %v596_v21  ;;  %p733_p7 = por %p732_p6, %p731_p5 }
  0x70   :  { %591 = vmatpush3.bf16.msra.mxu1 %v590_v11 }
  0x71   :  { %p734_p8 = pnand %p733_p7, %p727_p4 }
  0x72   :  { %599 = vmatpush1.bf16.msra.mxu0 %v598_v25 }
  0x73   :  { %601 = vmatprep.subr.bf16.mxu0 %v600_v26 }
  0x76   :  { %603 = vmatpush1.bf16.msra.mxu0 %v602_v31 }
  0x77   :  { %605 = vmatprep.subr.bf16.mxu0 %v604_v32 }
  0x7a   :  { %607 = vmatpush1.bf16.msra.mxu0 %v606_v37 }
  0x7b   :  { %609 = vmatprep.subr.bf16.mxu0 %v608_v38 }
  0x7e   :  { %611 = vmatpush1.bf16.msra.mxu0 %v610_v43 }
  0x7f   :  { %613 = vmatprep.subr.bf16.mxu0 %v612_v44 }
  0x82   :  { %615 = vmatpush1.bf16.msra.mxu0 %v614_v49 }
  0x83   :  { %617 = vmatprep.subr.bf16.mxu0 %v616_v50 }
  0x86   :  { %619 = vmatpush1.bf16.msra.mxu0 %v618_v55 }
  0x87   :  { %621 = vmatprep.subr.bf16.mxu0 %v620_v56 }
  0x8a   :  { %623 = vmatpush1.bf16.msra.mxu0 %v622_v1 }
 0x140   :  { %v481_v57 = vpop.f32.mrb[0].mxu0 }
 0x141   :  { %v482_v59 = vpop.f32.mrb[1].mxu0 }
 0x142   :  { %v483_v60 = vadd.f32 %v482_v59, %v481_v57 }
 0x144   :  { %v194_v61 = vadd.f32 %v483_v60, %v444_v58 }
 0x146   :  { %534 = vmatmul.mubr.f32.vlgmr.msra.gmra.mrb[0].mxu1 %v194_v61 }
 0x219   :  { %v286_v3 = vpop.f32.mrb[0].mxu1 }
 0x21a   :  { %v287_v4 = vadd.f32 %v445_v2, %v286_v3  ;;  %v535_v5 = vpop.f32.mrb[1].mxu1 }
 0x21c   :  { %387 = vmatmul.mubr.f32.vlgmr.msra.gmra.mrb[2].mxu0 %v287_v4  ;;  %v401_v6 = vmul.f32 %v287_v4, %v287_v4 }
 0x21e   :  { %402 = vadd.xlane.f32.xlu0 %v401_v6 }
 0x2ab   :  { %v403_v7 = vpop.xlane.xlu0 %402 }
 0x2ac   :  { %v411_v9 = vmul.f32 %v447_v8, %v403_v7 }
 0x2ef   :  { %v388_v10 = vpop.f32.mrb[2].mxu0 }
 0x2f0   :  { %v390_v11 = vpop.f32.mrb[3].mxu0  ;;  %v400_v19 = vsub.f32 %v388_v10, %v446_v18 }
 0x2f1   :  { %v412_v13 = vsub.f32 %v411_v9, %v390_v11 }
 0x2f3   :  { %v420_v14 = vadd.f32 %v448_v12, %v412_v13 }
 0x2f5   :  { %v421_v15 = vmax.f32 %v420_v14, 0.0 }
 0x2f7   :  { %v422_v16 = vsub.f32 0.0, %v421_v15 }
 0x2f9   :  { %v423_v17 = vmul.f32 1.442695, %v422_v16 }
 0x2fb   :  { %636 = vpow2.f32 %v423_v17 }
 0x305   :  { %v637_v20 = vpop.eup %636 }
 0x306   :  { %v425_v21 = vmul.f32 %v637_v20, %v400_v19 }
 0x308   :  { %426 = vst [vmem:[#allocation10] sm:$0xff] %v425_v21 }
 0x309   :  { %737 = shalt.err (!%p734_p8)
}
 0x30a   :  { %s738_s27 = scalar_lea.hbm %s916_s9, 128 }
 0x30b   :  { %p739_p9 = scmp.ne.s32.totalorder %s916_s9, %s738_s27  ;;  %p742_p10 = scmp.lt.u32.totalorder %s738_s27, %s916_s9 }
 0x30d   :  { %p744_p11 = pnand %p742_p10, %p739_p9 }
 0x30f   :  { %747 = shalt.err (!%p744_p11)
}
 0x310   :  { %436 = dma.vmem_to_hbm [thread:$0]  %s434_s0, 128, %s916_s9, [#allocation4]  }
 0x311   :  { %754 = dma.done.wait [#allocation4], 128  }
 0x312   :  { %755 = vsyncadd [#allocation4], 4294967168 }
 0x313   :  { %440 = vsyncpa [#allocation3], 1 }
 0x314   :  { %441 = vsyncpa [#allocation6], 1 }
 0x315   :  { %442 = vsyncpa [#allocation9], 1 }
 0x316   :  { %443 = vsyncpa [#allocation4], 1 }

</bundles_post_ra>
